<compile_context>
chip_gen: v6e
topology: v6e:2x2x1
jax: 0.10.0
libtpu: 0.0.40
codegen_flags: <defaults>
</compile_context>

<pallas_src>
import functools

import jax
import jax.numpy as jnp
from jax.experimental import pallas as pl
from jax.experimental.pallas import tpu as pltpu

HEAD_PAD = 128  # lane-dense padded width of the fused classification+confidence heads


def domain_expert_kernel(x_ref, w1_ref, b1_ref, w2_ref, b2_ref,
                         wh_ref, bh_ref, out_ref, *, conf_col):
    # x streamed in f32 and cast to bf16 here (halves input HBM traffic vs a
    # wrapper-side cast); weights are pre-cast bf16, biases f32.
    # All matmuls accumulate in f32 on the MXU.
    x = x_ref[...].astype(jnp.bfloat16)

    # embedding_layer + ReLU
    h1 = jnp.dot(x, w1_ref[...], preferred_element_type=jnp.float32) + b1_ref[...]
    h1 = jnp.maximum(h1, 0.0)

    # domain_layer + ReLU
    h2 = jnp.dot(h1.astype(jnp.bfloat16), w2_ref[...],
                 preferred_element_type=jnp.float32) + b2_ref[...]
    h2 = jnp.maximum(h2, 0.0)

    # fused classification + confidence heads: one lane-padded matmul
    z = jnp.dot(h2.astype(jnp.bfloat16), wh_ref[...],
                preferred_element_type=jnp.float32) + bh_ref[...]

    # sigmoid only on the confidence lane; mask the exp input so strongly
    # negative classification logits can't overflow to +inf first.
    lane = jax.lax.broadcasted_iota(jnp.int32, z.shape, dimension=1)
    is_conf = lane == conf_col
    e = jnp.exp(jnp.where(is_conf, -z, 0.0))
    sig = pl.reciprocal(1.0 + e, approx=True)

    out_ref[...] = jnp.where(is_conf, sig, z).astype(out_ref.dtype)


def _round_up(x, m):
    return (x + m - 1) // m * m


def prepare_params(params):
    """One-time weight packing / casting (hoisted out of the per-call forward)."""
    H = params["w1"].shape[1]
    C = params["wc"].shape[1]
    assert C + 1 <= HEAD_PAD

    # Pack classification + confidence heads into one lane-padded [H, 128] weight/bias.
    wh = jnp.zeros((H, HEAD_PAD), jnp.float32)
    wh = wh.at[:, :C].set(params["wc"]).at[:, C:C + 1].set(params["wf"])
    bh = jnp.zeros((1, HEAD_PAD), jnp.float32)
    bh = bh.at[:, :C].set(params["bc"]).at[:, C:C + 1].set(params["bf"])

    return {
        "w1": params["w1"].astype(jnp.bfloat16),
        "b1": params["b1"].astype(jnp.float32),
        "w2": params["w2"].astype(jnp.bfloat16),
        "b2": params["b2"].astype(jnp.float32),
        "wh": wh.astype(jnp.bfloat16),
        "bh": bh,
        "num_classes": C,
    }


def domain_expert_forward(embeddings, prepared, *, tm=512):
    """embeddings: [B, E] f32. prepared: output of prepare_params."""
    B, E = embeddings.shape
    H = prepared["w1"].shape[1]
    C = prepared["num_classes"]

    # Batch tile: sublane-aligned, large enough to amortize the ~0.35us per-step
    # overhead, but split so the grid has >=2 steps whenever B allows it
    # (so ("parallel",) actually shards work across v7x's 2 TensorCores).
    TM = max(8, min(tm, _round_up(-(-B // 2), 8)))
    grid = pl.cdiv(B, TM)  # ragged last tile handled by Pallas block masking

    resident = lambda i: (0, 0)  # weights/biases stay in VMEM across the grid
    kernel = pl.pallas_call(
        functools.partial(domain_expert_kernel, conf_col=C),
        out_shape=jax.ShapeDtypeStruct((B, HEAD_PAD), jnp.bfloat16),
        grid=(grid,),
        in_specs=[
            pl.BlockSpec((TM, E), lambda i: (i, 0)),   # embeddings: streamed per tile
            pl.BlockSpec((E, H), resident),            # w1
            pl.BlockSpec((1, H), resident),            # b1
            pl.BlockSpec((H, H), resident),            # w2
            pl.BlockSpec((1, H), resident),            # b2
            pl.BlockSpec((H, HEAD_PAD), resident),     # fused heads weight
            pl.BlockSpec((1, HEAD_PAD), resident),     # fused heads bias
        ],
        out_specs=pl.BlockSpec((TM, HEAD_PAD), lambda i: (i, 0)),
        compiler_params=pltpu.CompilerParams(
            dimension_semantics=("parallel",),         # shard batch tiles across TCs
        ),
    )
    out = kernel(embeddings.astype(jnp.float32),
                 prepared["w1"], prepared["b1"],
                 prepared["w2"], prepared["b2"],
                 prepared["wh"], prepared["bh"])

    # lane-dense bf16 slab -> (B, C) f32 logits and (B, 1) f32 confidence
    cls = out[:, :C].astype(jnp.float32)
    conf = out[:, C:C + 1].astype(jnp.float32)
    return cls, conf


def init_params(key, embedding_dim, hidden_dim, num_classes):
    """Deterministic synthetic init; weights stored as [in, out]."""
    ks = jax.random.split(key, 8)
    scale = 0.02
    return {
        "w1": scale * jax.random.normal(ks[0], (embedding_dim, hidden_dim), jnp.float32),
        "b1": scale * jax.random.normal(ks[1], (1, hidden_dim), jnp.float32),
        "w2": scale * jax.random.normal(ks[2], (hidden_dim, hidden_dim), jnp.float32),
        "b2": scale * jax.random.normal(ks[3], (1, hidden_dim), jnp.float32),
        "wc": scale * jax.random.normal(ks[4], (hidden_dim, num_classes), jnp.float32),
        "bc": scale * jax.random.normal(ks[5], (1, num_classes), jnp.float32),
        "wf": scale * jax.random.normal(ks[6], (hidden_dim, 1), jnp.float32),
        "bf": scale * jax.random.normal(ks[7], (1, 1), jnp.float32),
    }


def reference_forward(embeddings, p):
    h1 = jax.nn.relu(embeddings @ p["w1"] + p["b1"])
    h2 = jax.nn.relu(h1 @ p["w2"] + p["b2"])
    cls = h2 @ p["wc"] + p["bc"]
    conf = jax.nn.sigmoid(h2 @ p["wf"] + p["bf"])
    return cls, conf


if __name__ == "__main__":
    # Small shapes consistent with the module's Linear stack (scaled down from
    # embedding_dim=768, hidden_dim=512, num_classes=3).
    batch = 8
    embedding_dim = 128
    hidden_dim = 128
    num_classes = 3

    key = jax.random.PRNGKey(0)
    k_x, k_p = jax.random.split(key)
    embeddings = jax.random.normal(k_x, (batch, embedding_dim), jnp.float32)
    params = init_params(k_p, embedding_dim, hidden_dim, num_classes)

    prepared = prepare_params(params)          # one-time packing / bf16 casts
    cls, conf = domain_expert_forward(embeddings, prepared)
    jax.block_until_ready((cls, conf))

    # Sanity check against the plain-JAX f32 reference.
    # Tolerance loosened because MXU operands and output slab are bf16.
    cls_ref, conf_ref = reference_forward(embeddings, params)
    assert cls.shape == cls_ref.shape and conf.shape == conf_ref.shape
    assert jnp.allclose(cls, cls_ref, atol=2e-2, rtol=2e-2)
    assert jnp.allclose(conf, conf_ref, atol=2e-2, rtol=2e-2)

    print("KERNEL_OK")
</pallas_src>

<mosaic_0001>
module attributes {stable_mosaic.version = 11 : i64} {
  func.func @domain_expert_kernel(%arg0: i32, %arg1: memref<8x128xf32, #tpu.memory_space<vmem>>, %arg2: memref<128x128xbf16, #tpu.memory_space<vmem>>, %arg3: memref<1x128xf32, #tpu.memory_space<vmem>>, %arg4: memref<128x128xbf16, #tpu.memory_space<vmem>>, %arg5: memref<1x128xf32, #tpu.memory_space<vmem>>, %arg6: memref<128x128xbf16, #tpu.memory_space<vmem>>, %arg7: memref<1x128xf32, #tpu.memory_space<vmem>>, %arg8: memref<8x128xbf16, #tpu.memory_space<vmem>>) attributes {dimension_semantics = [#tpu.dimension_semantics<parallel>], iteration_bounds = array<i64: 1>, scalar_prefetch = 0 : i64, scratch_operands = 0 : i64, tpu.core_type = #tpu.core_type<tc>, window_params = [{transform_indices = @transform_0, window_bounds = array<i64: 8, 128>}, {pipeline_mode = #tpu.pipeline_mode<synchronous>, transform_indices = @transform_1, window_bounds = array<i64: 128, 128>}, {pipeline_mode = #tpu.pipeline_mode<synchronous>, transform_indices = @transform_2, window_bounds = array<i64: 1, 128>}, {pipeline_mode = #tpu.pipeline_mode<synchronous>, transform_indices = @transform_3, window_bounds = array<i64: 128, 128>}, {pipeline_mode = #tpu.pipeline_mode<synchronous>, transform_indices = @transform_4, window_bounds = array<i64: 1, 128>}, {pipeline_mode = #tpu.pipeline_mode<synchronous>, transform_indices = @transform_5, window_bounds = array<i64: 128, 128>}, {pipeline_mode = #tpu.pipeline_mode<synchronous>, transform_indices = @transform_6, window_bounds = array<i64: 1, 128>}, {transform_indices = @transform_7, window_bounds = array<i64: 8, 128>}]} {
    %c0 = arith.constant 0 : index
    %c0_0 = arith.constant 0 : index
    %0 = vector.load %arg1[%c0, %c0_0] : memref<8x128xf32, #tpu.memory_space<vmem>>, vector<8x128xf32>
    %1 = arith.truncf %0 : vector<8x128xf32> to vector<8x128xbf16>
    %c0_1 = arith.constant 0 : index
    %c0_2 = arith.constant 0 : index
    %2 = vector.load %arg2[%c0_1, %c0_2] : memref<128x128xbf16, #tpu.memory_space<vmem>>, vector<128x128xbf16>
    %cst = arith.constant dense<0.000000e+00> : vector<8x128xf32>
    %3 = tpu.matmul %1, %2, %cst {dimension_numbers = #tpu.dot_dimension_numbers<[1], [0], [0], [1], [0, 0, 1, 1], [], []>} : vector<8x128xbf16>, vector<128x128xbf16>, vector<8x128xf32> -> vector<8x128xf32>
    %c0_3 = arith.constant 0 : index
    %c0_4 = arith.constant 0 : index
    %4 = vector.load %arg3[%c0_3, %c0_4] : memref<1x128xf32, #tpu.memory_space<vmem>>, vector<1x128xf32>
    %5 = vector.broadcast %4 : vector<1x128xf32> to vector<8x128xf32>
    %6 = arith.addf %3, %5 : vector<8x128xf32>
    %cst_5 = arith.constant 0.000000e+00 : f32
    %7 = vector.broadcast %cst_5 : f32 to vector<8x128xf32>
    %8 = arith.maximumf %6, %7 : vector<8x128xf32>
    %9 = arith.truncf %8 : vector<8x128xf32> to vector<8x128xbf16>
    %c0_6 = arith.constant 0 : index
    %c0_7 = arith.constant 0 : index
    %10 = vector.load %arg4[%c0_6, %c0_7] : memref<128x128xbf16, #tpu.memory_space<vmem>>, vector<128x128xbf16>
    %cst_8 = arith.constant dense<0.000000e+00> : vector<8x128xf32>
    %11 = tpu.matmul %9, %10, %cst_8 {dimension_numbers = #tpu.dot_dimension_numbers<[1], [0], [0], [1], [0, 0, 1, 1], [], []>} : vector<8x128xbf16>, vector<128x128xbf16>, vector<8x128xf32> -> vector<8x128xf32>
    %c0_9 = arith.constant 0 : index
    %c0_10 = arith.constant 0 : index
    %12 = vector.load %arg5[%c0_9, %c0_10] : memref<1x128xf32, #tpu.memory_space<vmem>>, vector<1x128xf32>
    %13 = vector.broadcast %12 : vector<1x128xf32> to vector<8x128xf32>
    %14 = arith.addf %11, %13 : vector<8x128xf32>
    %cst_11 = arith.constant 0.000000e+00 : f32
    %15 = vector.broadcast %cst_11 : f32 to vector<8x128xf32>
    %16 = arith.maximumf %14, %15 : vector<8x128xf32>
    %17 = arith.truncf %16 : vector<8x128xf32> to vector<8x128xbf16>
    %c0_12 = arith.constant 0 : index
    %c0_13 = arith.constant 0 : index
    %18 = vector.load %arg6[%c0_12, %c0_13] : memref<128x128xbf16, #tpu.memory_space<vmem>>, vector<128x128xbf16>
    %cst_14 = arith.constant dense<0.000000e+00> : vector<8x128xf32>
    %19 = tpu.matmul %17, %18, %cst_14 {dimension_numbers = #tpu.dot_dimension_numbers<[1], [0], [0], [1], [0, 0, 1, 1], [], []>} : vector<8x128xbf16>, vector<128x128xbf16>, vector<8x128xf32> -> vector<8x128xf32>
    %c0_15 = arith.constant 0 : index
    %c0_16 = arith.constant 0 : index
    %20 = vector.load %arg7[%c0_15, %c0_16] : memref<1x128xf32, #tpu.memory_space<vmem>>, vector<1x128xf32>
    %21 = vector.broadcast %20 : vector<1x128xf32> to vector<8x128xf32>
    %22 = arith.addf %19, %21 : vector<8x128xf32>
    %23 = tpu.iota {dimensions = array<i32: 1>} : vector<8x128xi32>
    %c3_i32 = arith.constant 3 : i32
    %24 = vector.broadcast %c3_i32 : i32 to vector<8x128xi32>
    %25 = arith.cmpi eq, %23, %24 : vector<8x128xi32>
    %cst_17 = arith.constant 0.000000e+00 : f32
    %26 = vector.broadcast %cst_17 : f32 to vector<8x128xf32>
    %27 = arith.subf %26, %22 : vector<8x128xf32>
    %cst_18 = arith.constant 0.000000e+00 : f32
    %28 = vector.broadcast %cst_18 : f32 to vector<8x128xf32>
    %29 = arith.select %25, %27, %28 : vector<8x128xi1>, vector<8x128xf32>
    %30 = math.exp %29 : vector<8x128xf32>
    %cst_19 = arith.constant 1.000000e+00 : f32
    %31 = vector.broadcast %cst_19 : f32 to vector<8x128xf32>
    %32 = arith.addf %31, %30 : vector<8x128xf32>
    %33 = tpu.reciprocal %32 {approx = true} : vector<8x128xf32> -> vector<8x128xf32>
    %34 = arith.select %25, %33, %22 : vector<8x128xi1>, vector<8x128xf32>
    %35 = arith.truncf %34 : vector<8x128xf32> to vector<8x128xbf16>
    %c0_20 = arith.constant 0 : index
    %c0_21 = arith.constant 0 : index
    %36 = vector.load %arg8[%c0_20, %c0_21] : memref<8x128xbf16, #tpu.memory_space<vmem>>, vector<8x128xbf16>
    tpu.vector_store %arg8[%c0_20, %c0_21], %35 {strides = array<i32>} : memref<8x128xbf16, #tpu.memory_space<vmem>>, vector<8x128xbf16>,
    return
  }
  func.func @transform_0(%arg0: i32) -> (i32, i32) {
    %c0_i32 = arith.constant 0 : i32
    %c0_i32_0 = arith.constant 0 : i32
    return %arg0, %c0_i32 : i32, i32
  }
  func.func @transform_1(%arg0: i32) -> (i32, i32) {
    %c0_i32 = arith.constant 0 : i32
    %c0_i32_0 = arith.constant 0 : i32
    %c0_i32_1 = arith.constant 0 : i32
    return %c0_i32, %c0_i32_0 : i32, i32
  }
  func.func @transform_2(%arg0: i32) -> (i32, i32) {
    %c0_i32 = arith.constant 0 : i32
    %c0_i32_0 = arith.constant 0 : i32
    %c0_i32_1 = arith.constant 0 : i32
    return %c0_i32, %c0_i32_0 : i32, i32
  }
  func.func @transform_3(%arg0: i32) -> (i32, i32) {
    %c0_i32 = arith.constant 0 : i32
    %c0_i32_0 = arith.constant 0 : i32
    %c0_i32_1 = arith.constant 0 : i32
    return %c0_i32, %c0_i32_0 : i32, i32
  }
  func.func @transform_4(%arg0: i32) -> (i32, i32) {
    %c0_i32 = arith.constant 0 : i32
    %c0_i32_0 = arith.constant 0 : i32
    %c0_i32_1 = arith.constant 0 : i32
    return %c0_i32, %c0_i32_0 : i32, i32
  }
  func.func @transform_5(%arg0: i32) -> (i32, i32) {
    %c0_i32 = arith.constant 0 : i32
    %c0_i32_0 = arith.constant 0 : i32
    %c0_i32_1 = arith.constant 0 : i32
    return %c0_i32, %c0_i32_0 : i32, i32
  }
  func.func @transform_6(%arg0: i32) -> (i32, i32) {
    %c0_i32 = arith.constant 0 : i32
    %c0_i32_0 = arith.constant 0 : i32
    %c0_i32_1 = arith.constant 0 : i32
    return %c0_i32, %c0_i32_0 : i32, i32
  }
  func.func @transform_7(%arg0: i32) -> (i32, i32) {
    %c0_i32 = arith.constant 0 : i32
    %c0_i32_0 = arith.constant 0 : i32
    return %arg0, %c0_i32 : i32, i32
  }
}

</mosaic_0001>

<bundles_post_ra>
// kernel: tpu_custom_call.1
= control target key start
LH: loop header
LB: loop body
LE: loop exit
PB: predicated region body
PF: predicated region fallthrough
CT: control target
= control target key end

     0   :  { %12 = vsyncpa [#allocation3], 0  ;;  %s820_s0 = inlined_call_operand.hbm [shape: f32[8,128], index: 0, kind: input, shape index: {}]   ;;  %s821_s1 = inlined_call_operand.hbm [shape: bf16[128,128], index: 1, kind: input, shape index: {}]   ;;  %s822_s2 = inlined_call_operand.vmem [shape: f32[1,128], index: 2, kind: input, shape index: {}]   ;;  %s823_s3 = inlined_call_operand.hbm [shape: bf16[128,128], index: 3, kind: input, shape index: {}]   ;;  %s824_s4 = inlined_call_operand.vmem [shape: f32[1,128], index: 4, kind: input, shape index: {}]   ;;  %s825_s5 = inlined_call_operand.hbm [shape: bf16[128,128], index: 5, kind: input, shape index: {}]   ;;  %s826_s6 = inlined_call_operand.vmem [shape: f32[1,128], index: 6, kind: input, shape index: {}]   ;;  %s827_s7 = inlined_call_operand.hbm [shape: bf16[8,128], index: 7, kind: output, shape index: {}]  }
   0x1   :  { %13 = vsyncpa [#allocation6], 0 }
   0x2   :  { %14 = vsyncpa [#allocation9], 0 }
   0x3   :  { %15 = vsyncpa [#allocation4], 0  ;;  %s708_s24 = smov [#allocation5]  }
   0x4   :  { %s31_s25 = sshll.u32 %s708_s24, 4  ;;  %s32_s25 = int_to_ptr.vmem [resolvable:$true] %s31_s25 }
   0x5   :  { %s608_s26 = scalar_lea.vmem %s32_s25, 1024  ;;  %p613_p1 = scmp.lt.s32.totalorder %s32_s25, %s32_s25 }
   0x6   :  { %p609_p0 = scmp.ne.s32.totalorder %s32_s25, %s608_s26  ;;  %p614_p2 = scmp.lt.s32.totalorder %s608_s26, %s608_s26 }
   0x8   :  { %p615_p3 = por %p614_p2, %p613_p1 }
   0xa   :  { %p616_p4 = pnand %p615_p3, %p609_p0 }
   0xc   :  { %619 = shalt.err (!%p616_p4)
}
   0xd   :  { %s709_s27 = smov 64   ;;  %s710_s28 = smov 4  }
   0xe   :  { %37 = dma.hbm_to_vmem [thread:$0]  %s821_s1, 1024, %s32_s25, [#allocation6], %s709_s27, %s709_s27, %s710_s28  }
   0xf   :  { %s711_s8 = smov [#allocation2]   ;;  %s712_s10 = smov [#allocation7]  }
  0x10   :  { %s22_s9 = sshll.u32 %s711_s8, 4  ;;  %s45_s11 = sshll.u32 %s712_s10, 4  ;;  %s23_s9 = int_to_ptr.vmem [resolvable:$true] %s22_s9  ;;  %s46_s11 = int_to_ptr.vmem [resolvable:$true] %s45_s11 }
  0x11   :  { %s628_s12 = scalar_lea.vmem %s23_s9, 128  ;;  %p633_p6 = scmp.lt.s32.totalorder %s23_s9, %s23_s9 }
  0x12   :  { %p629_p5 = scmp.ne.s32.totalorder %s23_s9, %s628_s12  ;;  %p634_p7 = scmp.lt.s32.totalorder %s628_s12, %s628_s12 }
  0x14   :  { %p635_p8 = por %p634_p7, %p633_p6 }
  0x16   :  { %p636_p9 = pnand %p635_p8, %p629_p5 }
  0x18   :  { %639 = shalt.err (!%p636_p9)
}
  0x19   :  { %25 = dma.hbm_to_vmem [thread:$0]  %s820_s0, 128, %s23_s9, [#allocation3]  }
  0x1a   :  { %s648_s15 = scalar_lea.vmem %s46_s11, 1024  ;;  %p653_p11 = scmp.lt.s32.totalorder %s46_s11, %s46_s11 }
  0x1b   :  { %p649_p10 = scmp.ne.s32.totalorder %s46_s11, %s648_s15  ;;  %p654_p12 = scmp.lt.s32.totalorder %s648_s15, %s648_s15 }
  0x1d   :  { %p655_p13 = por %p654_p12, %p653_p11 }
  0x1f   :  { %p656_p0 = pnand %p655_p13, %p649_p10 }
  0x21   :  { %659 = shalt.err (!%p656_p0)
}
  0x22   :  { %51 = dma.hbm_to_vmem [thread:$0]  %s823_s3, 1024, %s46_s11, [#allocation6], %s709_s27, %s709_s27, %s710_s28  }
  0x23   :  { %s713_s17 = smov [#allocation8]  }
  0x24   :  { %s59_s18 = sshll.u32 %s713_s17, 4  ;;  %s60_s18 = int_to_ptr.vmem [resolvable:$true] %s59_s18 }
  0x25   :  { %s668_s19 = scalar_lea.vmem %s60_s18, 1024  ;;  %p673_p2 = scmp.lt.s32.totalorder %s60_s18, %s60_s18 }
  0x26   :  { %p669_p1 = scmp.ne.s32.totalorder %s60_s18, %s668_s19  ;;  %p674_p3 = scmp.lt.s32.totalorder %s668_s19, %s668_s19 }
  0x28   :  { %p675_p4 = por %p674_p3, %p673_p2 }
  0x2a   :  { %p676_p5 = pnand %p675_p4, %p669_p1 }
  0x2c   :  { %679 = shalt.err (!%p676_p5)
}
  0x2d   :  { %65 = dma.hbm_to_vmem [thread:$0]  %s825_s5, 1024, %s60_s18, [#allocation9], %s709_s27, %s709_s27, %s710_s28  }
  0x2e   :  { %700 = dma.done.wait [#allocation3], 128  }
  0x2f   :  { %701 = vsyncadd [#allocation3], 4294967168 }
  0x30   :  { %702 = dma.done.wait [#allocation6], 2048  }
  0x31   :  { %703 = vsyncadd [#allocation6], 4294965248 }
  0x32   :  { %704 = dma.done.wait [#allocation9], 1024  }
  0x33   :  { %705 = vsyncadd [#allocation9], 4294966272  ;;  %v714_v0 = vmov 0.0   ;;  %vm715_vm0 = vmmov 0   ;;  %v572_v1 = vld [vmem:[#allocation5 + $0x38] sm:$0xff]   ;;  %v573_v2 = vld [vmem:[#allocation5 + $0x30] sm:$0xff]   ;;  %v420_v43 = vlaneseq }
  0x34   :  { %503 = vmatprep.subr.bf16.mxu0 %v714_v0  ;;  %519 = vmatprep.mubr.msk.bf16.mxu0 %vm715_vm0, %v714_v0  ;;  %v574_v3 = vld [vmem:[#allocation5 + $0x28] sm:$0xff]   ;;  %v580_v4 = vld [vmem:[#allocation7 + $0x38] sm:$0xff]   ;;  %v575_v5 = vld [vmem:[#allocation5 + $0x20] sm:$0xff]  }
  0x35   :  { %523 = vmatprep.subr.bf16.mxu1 %v714_v0  ;;  %539 = vmatprep.mubr.msk.bf16.mxu1 %vm715_vm0, %v714_v0  ;;  %v581_v6 = vld [vmem:[#allocation7 + $0x30] sm:$0xff]   ;;  %v576_v7 = vld [vmem:[#allocation5 + $0x18] sm:$0xff]   ;;  %v582_v8 = vld [vmem:[#allocation7 + $0x28] sm:$0xff]   ;;  %v421_v45 = vand.u32 127, %v420_v43 }
  0x36   :  { %504 = vmatpush3.bf16.msra.mxu0 %v572_v1  ;;  %524 = vmatpush3.bf16.msra.mxu1 %v580_v4  ;;  %v577_v9 = vld [vmem:[#allocation5 + $0x10] sm:$0xff]   ;;  %v583_v10 = vld [vmem:[#allocation7 + $0x20] sm:$0xff]   ;;  %v578_v11 = vld [vmem:[#allocation5 + $0x8] sm:$0xff]  }
  0x37   :  { %505 = vmatprep.subr.bf16.mxu0 %v714_v0  ;;  %525 = vmatprep.subr.bf16.mxu1 %v714_v0  ;;  %v584_v12 = vld [vmem:[#allocation7 + $0x18] sm:$0xff]   ;;  %v579_v13 = vld [vmem:[#allocation5] sm:$0xff]   ;;  %v585_v15 = vld [vmem:[#allocation7 + $0x10] sm:$0xff]   ;;  %vm422_vm1 = vcmp.eq.s32.totalorder %v421_v45, 3 }
  0x38   :  { %v81_v14 = vld [vmem:[#allocation2] sm:$0xff]  ;;  %v586_v17 = vld [vmem:[#allocation7 + $0x8] sm:$0xff]   ;;  %v587_v18 = vld [vmem:[#allocation7] sm:$0xff]  }
  0x39   :  { %v82_v16 = vpack.c.bf16 %v81_v14, %v81_v14  ;;  %v588_v19 = vld [vmem:[#allocation8 + $0x38] sm:$0xff]   ;;  %v589_v20 = vld [vmem:[#allocation8 + $0x30] sm:$0xff]   ;;  %v590_v21 = vld [vmem:[#allocation8 + $0x28] sm:$0xff]  }
  0x3a   :  { %506 = vmatpush3.bf16.msra.mxu0 %v573_v2  ;;  %526 = vmatpush3.bf16.msra.mxu1 %v581_v6  ;;  %v591_v22 = vld [vmem:[#allocation8 + $0x20] sm:$0xff]   ;;  %v592_v23 = vld [vmem:[#allocation8 + $0x18] sm:$0xff]   ;;  %v593_v24 = vld [vmem:[#allocation8 + $0x10] sm:$0xff]  }
  0x3b   :  { %507 = vmatprep.subr.bf16.mxu0 %v714_v0  ;;  %527 = vmatprep.subr.bf16.mxu1 %v714_v0  ;;  %v449_v25 = vld [vmem:[%s822_s2] ss:$0 sm:$0xff]  ;;  %v594_v33 = vld [vmem:[#allocation8 + $0x8] sm:$0xff]   ;;  %v595_v34 = vld [vmem:[#allocation8] sm:$0xff]  }
  0x3c   :  { %v458_v35 = vld [vmem:[%s824_s4] ss:$0 sm:$0xff]  ;;  %s716_s4 = smov [#allocation10]  }
  0x3d   :  { %v467_v44 = vld [vmem:[%s826_s6] ss:$0 sm:$0xff]  ;;  %s438_s24 = sshll.u32 %s716_s4, 4  ;;  %s439_s24 = int_to_ptr.vmem [resolvable:$true] %s438_s24 }
  0x3e   :  { %508 = vmatpush3.bf16.msra.mxu0 %v574_v3  ;;  %528 = vmatpush3.bf16.msra.mxu1 %v582_v8  ;;  %s680_s6 = scalar_lea.vmem %s439_s24, 64  ;;  %p685_p7 = scmp.lt.s32.totalorder %s439_s24, %s439_s24 }
  0x3f   :  { %509 = vmatprep.subr.bf16.mxu0 %v714_v0  ;;  %529 = vmatprep.subr.bf16.mxu1 %v714_v0  ;;  %p681_p6 = scmp.ne.s32.totalorder %s439_s24, %s680_s6  ;;  %p686_p8 = scmp.lt.s32.totalorder %s680_s6, %s680_s6 }
  0x41   :  { %p687_p9 = por %p686_p8, %p685_p7 }
  0x42   :  { %510 = vmatpush3.bf16.msra.mxu0 %v575_v5  ;;  %530 = vmatpush3.bf16.msra.mxu1 %v583_v10 }
  0x43   :  { %511 = vmatprep.subr.bf16.mxu0 %v714_v0  ;;  %531 = vmatprep.subr.bf16.mxu1 %v714_v0  ;;  %p688_p10 = pnand %p687_p9, %p681_p6 }
  0x46   :  { %512 = vmatpush3.bf16.msra.mxu0 %v576_v7  ;;  %532 = vmatpush3.bf16.msra.mxu1 %v584_v12 }
  0x47   :  { %513 = vmatprep.subr.bf16.mxu0 %v714_v0  ;;  %533 = vmatprep.subr.bf16.mxu1 %v714_v0 }
  0x4a   :  { %514 = vmatpush3.bf16.msra.mxu0 %v577_v9  ;;  %534 = vmatpush3.bf16.msra.mxu1 %v585_v15 }
  0x4b   :  { %515 = vmatprep.subr.bf16.mxu0 %v714_v0  ;;  %535 = vmatprep.subr.bf16.mxu1 %v714_v0 }
  0x4e   :  { %516 = vmatpush3.bf16.msra.mxu0 %v578_v11  ;;  %536 = vmatpush3.bf16.msra.mxu1 %v586_v17 }
  0x4f   :  { %517 = vmatprep.subr.bf16.mxu0 %v714_v0  ;;  %537 = vmatprep.subr.bf16.mxu1 %v714_v0 }
  0x52   :  { %518 = vmatpush3.bf16.msra.mxu0 %v579_v13  ;;  %538 = vmatpush3.bf16.msra.mxu1 %v587_v18 }
  0x53   :  { %543 = vmatprep.subr.bf16.mxu0 %v714_v0 }
  0x55   :  { %520 = vmatmul.mubr.bf16.vlgmr.msra.gmra.mxu0 %v82_v16 }
  0x56   :  { %559 = vmatprep.mubr.msk.bf16.mxu0 %vm715_vm0, %v714_v0  ;;  %544 = vmatpush3.bf16.msra.mxu0 %v588_v19 }
  0x57   :  { %545 = vmatprep.subr.bf16.mxu0 %v714_v0 }
  0x5a   :  { %546 = vmatpush3.bf16.msra.mxu0 %v589_v20 }
  0x5b   :  { %547 = vmatprep.subr.bf16.mxu0 %v714_v0 }
  0x5e   :  { %548 = vmatpush3.bf16.msra.mxu0 %v590_v21 }
  0x5f   :  { %549 = vmatprep.subr.bf16.mxu0 %v714_v0 }
  0x62   :  { %550 = vmatpush3.bf16.msra.mxu0 %v591_v22 }
  0x63   :  { %551 = vmatprep.subr.bf16.mxu0 %v714_v0 }
  0x66   :  { %552 = vmatpush3.bf16.msra.mxu0 %v592_v23 }
  0x67   :  { %553 = vmatprep.subr.bf16.mxu0 %v714_v0 }
  0x6a   :  { %554 = vmatpush3.bf16.msra.mxu0 %v593_v24 }
  0x6b   :  { %555 = vmatprep.subr.bf16.mxu0 %v714_v0 }
  0x6e   :  { %556 = vmatpush3.bf16.msra.mxu0 %v594_v33 }
  0x6f   :  { %557 = vmatprep.subr.bf16.mxu0 %v714_v0 }
  0x72   :  { %558 = vmatpush3.bf16.msra.mxu0 %v595_v34 }
 0x115   :  { %v188_v26 = vpop.f32.mrf.mxu0 }
 0x116   :  { %v189_v27 = vadd.f32 %v449_v25, %v188_v26 }
 0x117   :  { %v521_v28 = vpop.f32.mrf.mxu0 }
 0x118   :  { %v194_v29 = vmax.f32 %v189_v27, 0.0 }
 0x119   :  { %v191_v30 = vpop.f32.mrf.mxu0 }
 0x11a   :  { %v195_v31 = vpack.c.bf16 %v194_v29, %v194_v29 }
 0x11b   :  { %v522_v32 = vpop.f32.mrf.mxu0 }
 0x11c   :  { %540 = vmatmul.mubr.bf16.vlgmr.msra.gmra.mxu1 %v195_v31 }
 0x1dc   :  { %v301_v36 = vpop.f32.mrf.mxu1 }
 0x1dd   :  { %v302_v37 = vadd.f32 %v458_v35, %v301_v36 }
 0x1de   :  { %v541_v38 = vpop.f32.mrf.mxu1 }
 0x1df   :  { %v307_v39 = vmax.f32 %v302_v37, 0.0 }
 0x1e0   :  { %v304_v40 = vpop.f32.mrf.mxu1 }
 0x1e1   :  { %v308_v41 = vpack.c.bf16 %v307_v39, %v307_v39 }
 0x1e2   :  { %v542_v42 = vpop.f32.mrf.mxu1 }
 0x1e3   :  { %560 = vmatmul.mubr.bf16.vlgmr.msra.gmra.mxu0 %v308_v41 }
 0x2a3   :  { %v414_v46 = vpop.f32.mrf.mxu0 }
 0x2a4   :  { %v415_v47 = vadd.f32 %v467_v44, %v414_v46 }
 0x2a5   :  { %v561_v48 = vpop.f32.mrf.mxu0 }
 0x2a6   :  { %v423_v49 = vsub.f32 0.0, %v415_v47 }
 0x2a7   :  { %v417_v50 = vpop.f32.mrf.mxu0 }
 0x2a8   :  { %v424_v51 = vsel %vm422_vm1, %v423_v49, 0.0 }
 0x2a9   :  { %v425_v52 = vmul.f32 1.442695, %v424_v51  ;;  %v562_v53 = vpop.f32.mrf.mxu0 }
 0x2ab   :  { %596 = vpow2.f32 %v425_v52 }
 0x2b8   :  { %v597_v54 = vpop.eup %596 }
 0x2b9   :  { %v427_v55 = vadd.f32 1.0, %v597_v54 }
 0x2bb   :  { %598 = vrcp.f32 %v427_v55 }
 0x2c8   :  { %v599_v56 = vpop.eup %598 }
 0x2c9   :  { %v429_v57 = vsel %vm422_vm1, %v599_v56, %v415_v47 }
 0x2ca   :  { %v430_v58 = vpack.c.bf16 %v429_v57, %v429_v57 }
 0x2cc   :  { %431 = vst [vmem:[#allocation10] sm:$0xf] %v430_v58 }
 0x2cd   :  { %691 = shalt.err (!%p688_p10)
}
 0x2ce   :  { %441 = dma.vmem_to_hbm [thread:$0]  %s439_s24, 64, %s827_s7, [#allocation4]  }
 0x2cf   :  { %706 = dma.done.wait [#allocation4], 64  }
 0x2d0   :  { %707 = vsyncadd [#allocation4], 4294967232 }
 0x2d1   :  { %445 = vsyncpa [#allocation3], 1 }
 0x2d2   :  { %446 = vsyncpa [#allocation6], 1 }
 0x2d3   :  { %447 = vsyncpa [#allocation9], 1 }
 0x2d4   :  { %448 = vsyncpa [#allocation4], 1 }

</bundles_post_ra>
